<compile_context>
chip_gen: v7x
topology: tpu7x:2x2x1
jax: 0.10.0
libtpu: 0.0.40
codegen_flags: <defaults>
</compile_context>

<pallas_src>
import jax
import jax.numpy as jnp
from jax.experimental import pallas as pl
from jax.experimental.pallas import tpu as pltpu

_LANE = 128
_SUBLANE = 8


def _make_kernel(C):
    def my_attention_kernel(w_ref, b_ref, x_ref, o_ref):
        # w_ref: SMEM (C,) f32, b_ref: SMEM (1,) f32   (scalar prefetch)
        # x_ref: VMEM (tb, C, thw), o_ref: VMEM (tb, thw)
        # Unrolled C-step VPU multiply-add; explicit f32 accumulation so a bf16
        # input path would not round the channel reduction / bias add.
        acc = x_ref[:, 0, :].astype(jnp.float32) * w_ref[0]
        for c in range(1, C):
            acc = acc + x_ref[:, c, :].astype(jnp.float32) * w_ref[c]
        acc = acc + b_ref[0]
        o_ref[...] = jnp.maximum(acc, 0.0).astype(o_ref.dtype)

    return my_attention_kernel


def _round_up(x, m):
    return -(-x // m) * m


def _vmem_capacity_bytes():
    try:
        return int(pltpu.get_tpu_info().vmem_capacity_bytes)
    except Exception:
        return 64 * 1024 * 1024  # conservative fallback (v7x per-TC VMEM)


def _choose_tiles(N, C, HWp, itemsize):
    c_pad = _round_up(C, _SUBLANE)  # (C, thw) minor tile pads C -> 8 sublanes
    capacity = _vmem_capacity_bytes()
    # Double-buffered working-set budget: 1/4 of physical VMEM, never above 32 MiB
    # (=> ~16 MiB on v7x, 32 MiB on v5e/v6e) so pipelining always stays intact.
    budget = min(capacity // 4, 32 * 1024 * 1024)

    # Spatial tile: lane-dense, capped so huge H*W streams through the pipeline.
    thw = min(HWp, 64 * _LANE)  # up to 8192 lanes per spatial step

    # Batch tile: largest tb keeping 2 x (input block + output block) under budget.
    per_row = 2 * (c_pad + 1) * thw * itemsize
    tb = max(1, budget // per_row)
    if tb >= N:
        tb = N
    else:
        tb = max(_SUBLANE, (tb // _SUBLANE) * _SUBLANE)

    # v7x megacore: keep >=2 parallel grid steps when there is real work so the
    # grid can shard across both TensorCores (irrelevant at tiny N).
    if N >= 16 and pl.cdiv(N, tb) * pl.cdiv(HWp, thw) < 2:
        tb = _round_up(pl.cdiv(N, 2), _SUBLANE)

    # Scoped-VMEM limit covering the chosen tiles (raises v5e's 16 MiB default).
    tb_pad = _round_up(tb, _SUBLANE)
    needed = 2 * tb_pad * (c_pad + 1) * thw * itemsize
    vmem_limit = min(capacity, max(2 * needed, 32 * 1024 * 1024))
    return tb, thw, vmem_limit


def my_attention_forward(x, weight, bias):
    """x: (N, C, H, W), weight: (1, C, 1, 1), bias: (1,). Returns (N, 1, H, W).

    Matches nn.Conv2d(C, 1, kernel_size=1, padding=0) + ReLU (module default
    kernel_size=1).
    """
    # TODO(synk): kernel_size > 1 (spatial conv with padding) is not implemented;
    # the module default kernel_size=1 is what this kernel covers.
    N, C, H, W = x.shape
    HW = H * W
    HWp = _round_up(HW, _LANE)  # guard the 128-lane assumption for arbitrary H, W
    itemsize = jnp.dtype(x.dtype).itemsize

    x3d = x.reshape(N, C, HW)
    if HWp != HW:
        x3d = jnp.pad(x3d, ((0, 0), (0, 0), (0, HWp - HW)))

    w1d = weight.reshape(C).astype(jnp.float32)
    b1d = bias.reshape(1).astype(jnp.float32)

    tb, thw, vmem_limit = _choose_tiles(N, C, HWp, itemsize)
    grid = (pl.cdiv(N, tb), pl.cdiv(HWp, thw))

    cost = pl.CostEstimate(
        flops=2 * N * C * HW,
        transcendentals=0,
        bytes_accessed=itemsize * N * (C + 1) * HW,
    )

    out = pl.pallas_call(
        _make_kernel(C),
        out_shape=jax.ShapeDtypeStruct((N, HWp), x.dtype),
        grid_spec=pltpu.PrefetchScalarGridSpec(
            num_scalar_prefetch=2,  # weight + bias -> SMEM scalars
            grid=grid,
            in_specs=[
                pl.BlockSpec((tb, C, thw), lambda i, j, w, b: (i, 0, j)),
            ],
            out_specs=pl.BlockSpec((tb, thw), lambda i, j, w, b: (i, j)),
        ),
        compiler_params=pltpu.CompilerParams(
            dimension_semantics=("parallel", "parallel"),
            vmem_limit_bytes=vmem_limit,
        ),
        cost_estimate=cost,
    )(w1d, b1d, x3d)

    if HWp != HW:
        out = out[:, :HW]
    return out.reshape(N, 1, H, W)


if __name__ == "__main__":
    # Module config: My_attention(input_channels=4, kernel_size=1)
    N, C, H, W = 2, 4, 16, 16

    key = jax.random.PRNGKey(0)
    kx, kw, kb = jax.random.split(key, 3)

    x = jax.random.normal(kx, (N, C, H, W), dtype=jnp.float32)
    # Conv2d(C, 1, kernel_size=1) parameters: weight (1, C, 1, 1), bias (1,)
    fan_in = C * 1 * 1
    bound = 1.0 / (fan_in ** 0.5)
    weight = jax.random.uniform(kw, (1, C, 1, 1), jnp.float32, -bound, bound)
    bias = jax.random.uniform(kb, (1,), jnp.float32, -bound, bound)

    out = my_attention_forward(x, weight, bias)
    out = jax.block_until_ready(out)

    # Reference check in plain JAX (1x1 conv + ReLU)
    ref = jnp.maximum(
        jnp.einsum("nchw,oc->nohw", x, weight.reshape(1, C))
        + bias.reshape(1, 1, 1, 1),
        0.0,
    )
    assert out.shape == (N, 1, H, W)
    assert jnp.allclose(out, ref, atol=1e-5, rtol=1e-5)

    print("KERNEL_OK")
</pallas_src>

<mosaic_0001>
module attributes {stable_mosaic.version = 11 : i64} {
  func.func @my_attention_kernel(%arg0: i32, %arg1: i32, %arg2: memref<4xf32, #tpu.memory_space<smem>>, %arg3: memref<1xf32, #tpu.memory_space<smem>>, %arg4: memref<2x4x256xf32, #tpu.memory_space<vmem>>, %arg5: memref<2x256xf32, #tpu.memory_space<vmem>>) attributes {dimension_semantics = [#tpu.dimension_semantics<parallel>, #tpu.dimension_semantics<parallel>], iteration_bounds = array<i64: 1, 1>, scalar_prefetch = 2 : i64, scratch_operands = 0 : i64, tpu.core_type = #tpu.core_type<tc>, window_params = [{transform_indices = @transform_0, window_bounds = array<i64: 2, 4, 256>}, {transform_indices = @transform_1, window_bounds = array<i64: 2, 256>}]} {
    %c0 = arith.constant 0 : index
    %c0_0 = arith.constant 0 : index
    %c0_1 = arith.constant 0 : index
    %0 = vector.load %arg4[%c0, %c0_0, %c0_1] : memref<2x4x256xf32, #tpu.memory_space<vmem>>, vector<2x1x256xf32>
    %1 = vector.shape_cast %0 : vector<2x1x256xf32> to vector<2x256xf32>
    %c0_2 = arith.constant 0 : index
    %2 = memref.load %arg2[%c0_2] : memref<4xf32, #tpu.memory_space<smem>>
    %3 = vector.broadcast %2 : f32 to vector<2x256xf32>
    %4 = arith.mulf %1, %3 : vector<2x256xf32>
    %c0_3 = arith.constant 0 : index
    %c1 = arith.constant 1 : index
    %c0_4 = arith.constant 0 : index
    %5 = vector.load %arg4[%c0_3, %c1, %c0_4] : memref<2x4x256xf32, #tpu.memory_space<vmem>>, vector<2x1x256xf32>
    %6 = vector.shape_cast %5 : vector<2x1x256xf32> to vector<2x256xf32>
    %c1_5 = arith.constant 1 : index
    %7 = memref.load %arg2[%c1_5] : memref<4xf32, #tpu.memory_space<smem>>
    %8 = vector.broadcast %7 : f32 to vector<2x256xf32>
    %9 = arith.mulf %6, %8 : vector<2x256xf32>
    %10 = arith.addf %4, %9 : vector<2x256xf32>
    %c0_6 = arith.constant 0 : index
    %c2 = arith.constant 2 : index
    %c0_7 = arith.constant 0 : index
    %11 = vector.load %arg4[%c0_6, %c2, %c0_7] : memref<2x4x256xf32, #tpu.memory_space<vmem>>, vector<2x1x256xf32>
    %12 = vector.shape_cast %11 : vector<2x1x256xf32> to vector<2x256xf32>
    %c2_8 = arith.constant 2 : index
    %13 = memref.load %arg2[%c2_8] : memref<4xf32, #tpu.memory_space<smem>>
    %14 = vector.broadcast %13 : f32 to vector<2x256xf32>
    %15 = arith.mulf %12, %14 : vector<2x256xf32>
    %16 = arith.addf %10, %15 : vector<2x256xf32>
    %c0_9 = arith.constant 0 : index
    %c3 = arith.constant 3 : index
    %c0_10 = arith.constant 0 : index
    %17 = vector.load %arg4[%c0_9, %c3, %c0_10] : memref<2x4x256xf32, #tpu.memory_space<vmem>>, vector<2x1x256xf32>
    %18 = vector.shape_cast %17 : vector<2x1x256xf32> to vector<2x256xf32>
    %c3_11 = arith.constant 3 : index
    %19 = memref.load %arg2[%c3_11] : memref<4xf32, #tpu.memory_space<smem>>
    %20 = vector.broadcast %19 : f32 to vector<2x256xf32>
    %21 = arith.mulf %18, %20 : vector<2x256xf32>
    %22 = arith.addf %16, %21 : vector<2x256xf32>
    %c0_12 = arith.constant 0 : index
    %23 = memref.load %arg3[%c0_12] : memref<1xf32, #tpu.memory_space<smem>>
    %24 = vector.broadcast %23 : f32 to vector<2x256xf32>
    %25 = arith.addf %22, %24 : vector<2x256xf32>
    %cst = arith.constant 0.000000e+00 : f32
    %26 = vector.broadcast %cst : f32 to vector<2x256xf32>
    %27 = arith.maximumf %25, %26 : vector<2x256xf32>
    %c0_13 = arith.constant 0 : index
    %c0_14 = arith.constant 0 : index
    %28 = vector.load %arg5[%c0_13, %c0_14] : memref<2x256xf32, #tpu.memory_space<vmem>>, vector<2x256xf32>
    tpu.vector_store %arg5[%c0_13, %c0_14], %27 {strides = array<i32>} : memref<2x256xf32, #tpu.memory_space<vmem>>, vector<2x256xf32>,
    return
  }
  func.func @transform_0(%arg0: i32, %arg1: i32, %arg2: memref<4xf32, #tpu.memory_space<smem>>, %arg3: memref<1xf32, #tpu.memory_space<smem>>) -> (i32, i32, i32) {
    %c0_i32 = arith.constant 0 : i32
    %c0_i32_0 = arith.constant 0 : i32
    return %arg0, %c0_i32, %arg1 : i32, i32, i32
  }
  func.func @transform_1(%arg0: i32, %arg1: i32, %arg2: memref<4xf32, #tpu.memory_space<smem>>, %arg3: memref<1xf32, #tpu.memory_space<smem>>) -> (i32, i32) {
    %c0_i32 = arith.constant 0 : i32
    return %arg0, %arg1 : i32, i32
  }
}

</mosaic_0001>

<bundles_post_ra>
// kernel: tpu_custom_call.1
= control target key start
LH: loop header
LB: loop body
LE: loop exit
PB: predicated region body
PF: predicated region fallthrough
CT: control target
= control target key end

     0   :  { %s228_s0 = inlined_call_operand.vmem [shape: f32[4], index: 0, kind: input, shape index: {}]   ;;  %s229_s1 = inlined_call_operand.<no memory space> [shape: f32[1], index: 1, kind: input, shape index: {}]   ;;  %s230_s2 = inlined_call_operand.hbm [shape: f32[2,4,256], index: 2, kind: input, shape index: {}]   ;;  %s231_s3 = inlined_call_operand.hbm [shape: f32[2,256], index: 3, kind: output, shape index: {}]  }
   0x1   :  { %s8_s14 = sshll.u32 %s228_s0, 4  ;;  %s9_s14 = int_to_ptr.vmem [resolvable:$true] %s8_s14 }
   0x2   :  { %s111_s15 = scalar_lea.vmem %s9_s14, 16  ;;  %p116_p1 = scmp.lt.s32.totalorder %s9_s14, %s9_s14 }
   0x3   :  { %p112_p0 = scmp.ne.s32.totalorder %s9_s14, %s111_s15  ;;  %p117_p2 = scmp.lt.s32.totalorder %s111_s15, %s111_s15 }
   0x5   :  { %p118_p3 = por %p117_p2, %p116_p1 }
   0x7   :  { %p119_p4 = pnand %p118_p3, %p112_p0 }
   0x9   :  { %122 = shalt.err (!%p119_p4)  }
   0xa   :  { %s173_s16 = smov [#allocation3]  }
   0xb   :  { %11 = dma.vmem_to_smem %s9_s14, 16, %s173_s16, [#allocation2] }
   0xc   :  { %167 = dma.done.wait [#allocation2], 16 }
   0xd   :  { %168 = vsyncadd [#allocation2], 4294967280 }
   0xe   :  { %14 = sfence }
   0xf   :  { %15 = vsyncpa [#allocation6], 0 }
  0x10   :  { %16 = vsyncpa [#allocation7], 0  ;;  %s174_s17 = smov [#allocation5]   ;;  %s123_s20 = scalar_lea.hbm %s230_s2, 256 }
  0x11   :  { %s22_s18 = sshll.u32 %s174_s17, 4  ;;  %p124_p5 = scmp.ne.s32.totalorder %s230_s2, %s123_s20  ;;  %s23_s18 = int_to_ptr.vmem [resolvable:$true] %s22_s18 }
  0x12   :  { %p127_p6 = scmp.lt.u32.totalorder %s123_s20, %s230_s2 }
  0x14   :  { %p129_p7 = pnand %p127_p6, %p124_p5 }
  0x16   :  { %132 = shalt.err (!%p129_p7)
}
  0x17   :  { %s133_s25 = scalar_lea.vmem %s23_s18, 256  ;;  %p138_p9 = scmp.lt.s32.totalorder %s23_s18, %s23_s18 }
  0x18   :  { %p134_p8 = scmp.ne.s32.totalorder %s23_s18, %s133_s25  ;;  %p139_p10 = scmp.lt.s32.totalorder %s133_s25, %s133_s25 }
  0x1a   :  { %p140_p11 = por %p139_p10, %p138_p9 }
  0x1c   :  { %p141_p12 = pnand %p140_p11, %p134_p8 }
  0x1e   :  { %144 = shalt.err (!%p141_p12)
}
  0x1f   :  { %s175_s26 = smov 128   ;;  %s176_s27 = smov 8  }
  0x20   :  { %28 = dma.hbm_to_vmem [thread:$0]  %s230_s2, 256, %s23_s18, [#allocation6], %s175_s26, %s175_s26, %s176_s27  }
  0x21   :  { %169 = dma.done.wait [#allocation6], 256  }
  0x22   :  { %170 = vsyncadd [#allocation6], 4294967040  ;;  %s35_s30 = sld [smem:[#allocation3]]  ;;  %s102_s4 = sld [smem:[#allocation3 + $0x1]]  ;;  %v70_v24 = vstv %s229_s1 }
  0x23   :  { %s103_s5 = sld [smem:[#allocation3 + $0x2]]  ;;  %s104_s6 = sld [smem:[#allocation3 + $0x3]]  ;;  %v32_v0 = vld [vmem:[#allocation5] ss:$4 sm:$0x3] }
  0x24   :  { %v34_v1 = vld [vmem:[#allocation5 + $0x8] ss:$4 sm:$0x3]  ;;  %v40_v6 = vld [vmem:[#allocation5 + $0x1] ss:$4 sm:$0x3] }
  0x25   :  { %v42_v7 = vld [vmem:[#allocation5 + $0x9] ss:$4 sm:$0x3]  ;;  %v50_v12 = vld [vmem:[#allocation5 + $0x2] ss:$4 sm:$0x3] }
  0x26   :  { %v52_v13 = vld [vmem:[#allocation5 + $0xa] ss:$4 sm:$0x3]  ;;  %v60_v16 = vld [vmem:[#allocation5 + $0x3] ss:$4 sm:$0x3] }
  0x27   :  { %v62_v17 = vld [vmem:[#allocation5 + $0xb] ss:$4 sm:$0x3]  ;;  %s177_s8 = smov [#allocation8]  }
  0x28   :  { %v36_v2 = vstv %s35_s30  ;;  %v44_v3 = vstv %s102_s4  ;;  %s93_s9 = sshll.u32 %s177_s8, 4  ;;  %s94_s9 = int_to_ptr.vmem [resolvable:$true] %s93_s9 }
  0x29   :  { %v37_v4 = vmul.f32 %v36_v2, %v32_v0  ;;  %v38_v5 = vmul.f32 %v36_v2, %v34_v1  ;;  %v54_v8 = vstv %s103_s5  ;;  %v64_v9 = vstv %s104_s6  ;;  %s145_s10 = scalar_lea.vmem %s94_s9, 64  ;;  %p150_p0 = scmp.lt.s32.totalorder %s94_s9, %s94_s9 }
  0x2a   :  { %v45_v10 = vmul.f32 %v44_v3, %v40_v6  ;;  %v46_v11 = vmul.f32 %v44_v3, %v42_v7  ;;  %v55_v14 = vmul.f32 %v54_v8, %v50_v12  ;;  %v56_v15 = vmul.f32 %v54_v8, %v52_v13  ;;  %p146_p13 = scmp.ne.s32.totalorder %s94_s9, %s145_s10  ;;  %p151_p1 = scmp.lt.s32.totalorder %s145_s10, %s145_s10 }
  0x2b   :  { %v65_v20 = vmul.f32 %v64_v9, %v60_v16  ;;  %v66_v21 = vmul.f32 %v64_v9, %v62_v17 }
  0x2c   :  { %v47_v18 = vadd.f32 %v45_v10, %v37_v4  ;;  %v48_v19 = vadd.f32 %v46_v11, %v38_v5  ;;  %p152_p2 = por %p151_p1, %p150_p0 }
  0x2e   :  { %v57_v22 = vadd.f32 %v55_v14, %v47_v18  ;;  %v58_v23 = vadd.f32 %v56_v15, %v48_v19  ;;  %p153_p3 = pnand %p152_p2, %p146_p13 }
  0x30   :  { %v67_v25 = vadd.f32 %v65_v20, %v57_v22  ;;  %v68_v26 = vadd.f32 %v66_v21, %v58_v23 }
  0x32   :  { %v71_v27 = vadd.f32 %v70_v24, %v67_v25  ;;  %v72_v28 = vadd.f32 %v70_v24, %v68_v26 }
  0x34   :  { %v73_v29 = vmax.f32 %v71_v27, 0.0  ;;  %v74_v30 = vmax.f32 %v72_v28, 0.0 }
  0x36   :  { %v77_v31 = vcombine.low %v73_v29, %v74_v30 }
  0x38   :  { %105 = vst.sshfl [vmem:[#allocation8] sm:$0x33 pattern:$0x75316420] %v77_v31 }
  0x39   :  { %156 = shalt.err (!%p153_p3)
}
  0x3a   :  { %s157_s12 = scalar_lea.hbm %s231_s3, 64 }
  0x3b   :  { %p158_p4 = scmp.ne.s32.totalorder %s231_s3, %s157_s12  ;;  %p161_p5 = scmp.lt.u32.totalorder %s157_s12, %s231_s3 }
  0x3d   :  { %p163_p6 = pnand %p161_p5, %p158_p4 }
  0x3f   :  { %166 = shalt.err (!%p163_p6)
}
  0x40   :  { %96 = dma.vmem_to_hbm [thread:$0]  %s94_s9, 64, %s231_s3, [#allocation7]  }
  0x41   :  { %171 = dma.done.wait [#allocation7], 64  }
  0x42   :  { %172 = vsyncadd [#allocation7], 4294967232 }
  0x43   :  { %100 = vsyncpa [#allocation6], 1 }
  0x44   :  { %101 = vsyncpa [#allocation7], 1 }

</bundles_post_ra>
